<compile_context>
chip_gen: v6e
topology: v6e:2x2x1
jax: 0.10.0
libtpu: 0.0.40
codegen_flags: <defaults>
</compile_context>

<pallas_src>
import functools

import jax
import jax.numpy as jnp
from jax.experimental import pallas as pl
from jax.experimental.pallas import tpu as pltpu


def _round_up(a: int, m: int) -> int:
    return (a + m - 1) // m * m


def _vmem_capacity_bytes() -> int:
    """Physical VMEM per TensorCore; conservative 64 MiB fallback (v7x)."""
    try:
        info = pltpu.get_tpu_info()
        cap = getattr(info, "vmem_capacity_bytes", None)
        if cap:
            return int(cap)
    except Exception:
        pass
    return 64 * 1024 * 1024


# ---------------------------------------------------------------------------
# Kernels
# ---------------------------------------------------------------------------
def _mlp_kernel_resident(x_ref, w1_ref, b1_ref, w2_ref, b2_ref, o_ref):
    """Both weight matrices resident in VMEM; grid tiles the batch only."""
    x = x_ref[...].astype(w1_ref.dtype)                      # in-kernel cast (VPU)
    h = jnp.dot(x, w1_ref[...], preferred_element_type=jnp.float32)
    h = jnp.maximum(h + b1_ref[...], 0.0)                    # bias + ReLU (f32)
    y = jnp.dot(h.astype(w2_ref.dtype), w2_ref[...],
                preferred_element_type=jnp.float32)
    o_ref[...] = (y + b2_ref[...]).astype(o_ref.dtype)


def _mlp_kernel_wtiled(x_ref, w1_ref, b1_ref, w2_ref, b2_ref, o_ref, h_ref):
    """Fallback: w1 resident, w2/b2/out tiled over grid axis 1 (out features).

    The hidden activation tile is computed once per batch block (j == 0) and
    cached in VMEM scratch for all out-feature tiles of that batch block.
    """
    @pl.when(pl.program_id(1) == 0)
    def _():
        x = x_ref[...].astype(w1_ref.dtype)
        h = jnp.dot(x, w1_ref[...], preferred_element_type=jnp.float32)
        h_ref[...] = jnp.maximum(h + b1_ref[...], 0.0).astype(h_ref.dtype)

    y = jnp.dot(h_ref[...], w2_ref[...], preferred_element_type=jnp.float32)
    o_ref[...] = (y + b2_ref[...]).astype(o_ref.dtype)


# ---------------------------------------------------------------------------
# Parameter preparation (hoisted out of the per-call path)
# ---------------------------------------------------------------------------
def prepare_f1_params(w1, b1, w2, b2, *, use_bf16: bool = False):
    """Pad feature dims to lane (128) multiples and cast once.

    w1: (input_sz, hidden)   (torch weight.T layout)
    b1: (hidden,) or (1, hidden)
    w2: (hidden, output_sz)
    b2: (output_sz,) or (1, output_sz)

    Padded hidden columns of w1/b1 and rows of w2 are zero, so they contribute
    exactly zero to the real outputs; padded output columns are sliced off.
    """
    hid = w1.shape[1]
    out_sz = w2.shape[1]
    hid_p = _round_up(hid, 128)
    out_p = _round_up(out_sz, 128)
    mm_dtype = jnp.bfloat16 if use_bf16 else w1.dtype

    w1p = jnp.pad(w1, ((0, 0), (0, hid_p - hid))).astype(mm_dtype)
    b1p = jnp.pad(jnp.reshape(b1, (1, -1)), ((0, 0), (0, hid_p - hid))).astype(jnp.float32)
    w2p = jnp.pad(w2, ((0, hid_p - hid), (0, out_p - out_sz))).astype(mm_dtype)
    b2p = jnp.pad(jnp.reshape(b2, (1, -1)), ((0, 0), (0, out_p - out_sz))).astype(jnp.float32)
    return w1p, b1p, w2p, b2p


# ---------------------------------------------------------------------------
# Forward
# ---------------------------------------------------------------------------
@functools.partial(
    jax.jit,
    static_argnames=("out_sz", "block_b", "x_buffers", "force_weight_tiling"),
)
def f1_forward(x, w1p, b1p, w2p, b2p, *, out_sz=None, block_b: int = 512,
               x_buffers: int = 2, force_weight_tiling: bool = False):
    """F1.forward: Linear -> ReLU -> Linear, fused in one Pallas kernel.

    x   : (B, input_sz)              (any float dtype; cast to mm dtype in-kernel)
    w1p : (input_sz, hid_p)          pre-padded / pre-cast via prepare_f1_params
    b1p : (1, hid_p)      float32
    w2p : (hid_p, out_p)
    b2p : (1, out_p)      float32
    returns (B, out_sz) in x.dtype.  Note: with bf16 params the matmul inputs
    (including the ReLU output) are bf16, accumulation stays f32 in-kernel.
    """
    B, in_sz = x.shape
    hid_p = w1p.shape[1]
    out_p = w2p.shape[1]
    if out_sz is None:
        out_sz = out_p
    mm_dtype = w1p.dtype
    out_dtype = x.dtype

    x_bytes = jnp.dtype(x.dtype).itemsize
    mm_bytes = jnp.dtype(mm_dtype).itemsize
    out_bytes = jnp.dtype(out_dtype).itemsize

    # Batch tile: 16-row aligned for bf16 (sublane packing), 8 otherwise;
    # split into >=2 blocks when B permits so the "parallel" grid axis shards
    # across v7x's 2 TensorCores (no effect on v5e/v6e).
    align = 16 if (mm_dtype == jnp.bfloat16 and B >= 16) else 8
    tb = min(block_b, _round_up(B, align))
    if tb >= B and B > align:
        tb = _round_up(pl.cdiv(B, 2), align)
    nb = pl.cdiv(B, tb)

    vmem_cap = _vmem_capacity_bytes()
    budget = int(0.70 * vmem_cap)          # ~45 MiB on v7x, ~90 MiB on v5e/v6e

    nbuf_x = max(2, x_buffers)

    def est_resident(tb_):
        return (nbuf_x * tb_ * in_sz * x_bytes            # pipelined x tiles
                + 2 * tb_ * out_p * out_bytes              # pipelined out tiles
                + (in_sz * hid_p + hid_p * out_p) * mm_bytes   # resident weights
                + (hid_p + out_p) * 4                      # resident biases
                + 2 * tb_ * hid_p * 4 + tb_ * out_p * 4)   # in-kernel temporaries

    def est_wtiled(tb_, tn_):
        return (nbuf_x * tb_ * in_sz * x_bytes
                + 2 * tb_ * tn_ * out_bytes
                + in_sz * hid_p * mm_bytes + hid_p * 4     # resident w1 / b1
                + 2 * (hid_p * tn_ * mm_bytes + tn_ * 4)   # double-buffered w2/b2 tiles
                + tb_ * hid_p * mm_bytes                   # h scratch
                + tb_ * hid_p * 4 + tb_ * tn_ * 4)         # temporaries

    use_resident = (not force_weight_tiling) and est_resident(tb) <= budget

    x_pm = pl.Buffered(x_buffers) if x_buffers > 2 else None

    def _x_spec(index_map):
        if x_pm is not None:
            return pl.BlockSpec((tb, in_sz), index_map, pipeline_mode=x_pm)
        return pl.BlockSpec((tb, in_sz), index_map)

    if use_resident:
        est = est_resident(tb)
        w2_reads = 1
        grid_spec = pltpu.PrefetchScalarGridSpec(
            num_scalar_prefetch=0,
            grid=(nb,),
            in_specs=[
                _x_spec(lambda i: (i, 0)),                     # x: tiled over batch
                pl.BlockSpec((in_sz, hid_p), lambda i: (0, 0)),  # w1: resident
                pl.BlockSpec((1, hid_p), lambda i: (0, 0)),      # b1: resident
                pl.BlockSpec((hid_p, out_p), lambda i: (0, 0)),  # w2: resident
                pl.BlockSpec((1, out_p), lambda i: (0, 0)),      # b2: resident
            ],
            out_specs=pl.BlockSpec((tb, out_p), lambda i: (i, 0)),
        )
        kernel = _mlp_kernel_resident
        dim_sem = ("parallel",)
    else:
        # Residency guard tripped (or forced): tile w2/b2/out over out_p.
        tn = out_p if not force_weight_tiling else min(128, out_p)
        while tn > 128 and est_wtiled(tb, tn) > budget:
            tn = max(128, _round_up(tn // 2, 128))
        while est_wtiled(tb, tn) > budget and tb > align:
            tb = max(align, _round_up(tb // 2, align))
        # TODO(synk): if w1 alone still exceeds the budget, a K-tiled first
        # matmul would be needed; not implemented here.
        nb = pl.cdiv(B, tb)
        nj = pl.cdiv(out_p, tn)
        est = est_wtiled(tb, tn)
        w2_reads = nb
        grid_spec = pltpu.PrefetchScalarGridSpec(
            num_scalar_prefetch=0,
            grid=(nb, nj),
            in_specs=[
                _x_spec(lambda i, j: (i, 0)),                       # x: per batch block
                pl.BlockSpec((in_sz, hid_p), lambda i, j: (0, 0)),  # w1: resident
                pl.BlockSpec((1, hid_p), lambda i, j: (0, 0)),      # b1: resident
                pl.BlockSpec((hid_p, tn), lambda i, j: (0, j)),     # w2: out-tiled
                pl.BlockSpec((1, tn), lambda i, j: (0, j)),         # b2: out-tiled
            ],
            out_specs=pl.BlockSpec((tb, tn), lambda i, j: (i, j)),
            scratch_shapes=[pltpu.VMEM((tb, hid_p), mm_dtype)],     # cached hidden acts
        )
        kernel = _mlp_kernel_wtiled
        dim_sem = ("parallel", "arbitrary")

    vmem_limit = int(min(max(int(1.25 * est), 32 * 1024 * 1024),
                         int(0.9 * vmem_cap)))

    cost = pl.CostEstimate(
        flops=2 * B * (in_sz * hid_p + hid_p * out_p),
        transcendentals=0,
        bytes_accessed=int(
            B * in_sz * x_bytes
            + in_sz * hid_p * mm_bytes + hid_p * 4
            + (hid_p * out_p * mm_bytes + out_p * 4) * w2_reads
            + B * out_p * out_bytes),
    )

    out_padded = pl.pallas_call(
        kernel,
        out_shape=jax.ShapeDtypeStruct((B, out_p), out_dtype),
        grid_spec=grid_spec,
        compiler_params=pltpu.CompilerParams(
            dimension_semantics=dim_sem,
            vmem_limit_bytes=vmem_limit,
        ),
        cost_estimate=cost,
    )(x, w1p, b1p, w2p, b2p)

    if out_p != out_sz:
        return out_padded[:, :out_sz]
    return out_padded


# ---------------------------------------------------------------------------
# Init (mimics nn.Linear default init, weights stored as (in, out) = torch W.T)
# ---------------------------------------------------------------------------
def init_f1_params(key, input_sz, output_sz, dtype=jnp.float32):
    hidden = output_sz // 2
    k1, k2, k3, k4 = jax.random.split(key, 4)
    lim1 = 1.0 / jnp.sqrt(input_sz)
    lim2 = 1.0 / jnp.sqrt(hidden)
    w1 = jax.random.uniform(k1, (input_sz, hidden), dtype, -lim1, lim1)
    b1 = jax.random.uniform(k2, (1, hidden), dtype, -lim1, lim1)
    w2 = jax.random.uniform(k3, (hidden, output_sz), dtype, -lim2, lim2)
    b2 = jax.random.uniform(k4, (1, output_sz), dtype, -lim2, lim2)
    return w1, b1, w2, b2


if __name__ == "__main__":
    key = jax.random.PRNGKey(0)

    # --- small config: resident-weight path ---------------------------------
    input_sz, output_sz, batch = 32, 64, 8
    kx, kp, kx2, kp2 = jax.random.split(key, 4)
    x = jax.random.normal(kx, (batch, input_sz), jnp.float32)
    w1, b1, w2, b2 = init_f1_params(kp, input_sz, output_sz)
    ref = jnp.maximum(x @ w1 + b1, 0.0) @ w2 + b2

    # f32 path (exact semantics of the PyTorch module).
    params_f32 = prepare_f1_params(w1, b1, w2, b2, use_bf16=False)
    out = f1_forward(x, *params_f32, out_sz=output_sz)
    jax.block_until_ready(out)
    assert out.shape == (batch, output_sz)
    assert jnp.allclose(out, ref, atol=1e-5, rtol=1e-5)

    # bf16 MXU path (prepared once; halves weight/x matmul bytes).
    params_bf16 = prepare_f1_params(w1, b1, w2, b2, use_bf16=True)
    out_bf16 = f1_forward(x, *params_bf16, out_sz=output_sz)
    jax.block_until_ready(out_bf16)
    assert out_bf16.shape == (batch, output_sz)
    assert jnp.allclose(out_bf16, ref, atol=5e-2, rtol=5e-2)

    # --- larger config: ragged batch, >=2 batch blocks, forced w2-tiled path -
    input_sz2, output_sz2, batch2 = 32, 256, 300
    x2 = jax.random.normal(kx2, (batch2, input_sz2), jnp.float32)
    w1b, b1b, w2b, b2b = init_f1_params(kp2, input_sz2, output_sz2)
    ref2 = jnp.maximum(x2 @ w1b + b1b, 0.0) @ w2b + b2b
    params2 = prepare_f1_params(w1b, b1b, w2b, b2b, use_bf16=False)
    out2 = f1_forward(x2, *params2, out_sz=output_sz2, force_weight_tiling=True)
    jax.block_until_ready(out2)
    assert out2.shape == (batch2, output_sz2)
    assert jnp.allclose(out2, ref2, atol=1e-3, rtol=1e-3)

    print("KERNEL_OK")
</pallas_src>

<mosaic_0001>
module attributes {stable_mosaic.version = 11 : i64} {
  func.func @_mlp_kernel_resident(%arg0: i32, %arg1: memref<8x32xf32, #tpu.memory_space<vmem>>, %arg2: memref<32x128xf32, #tpu.memory_space<vmem>>, %arg3: memref<1x128xf32, #tpu.memory_space<vmem>>, %arg4: memref<128x128xf32, #tpu.memory_space<vmem>>, %arg5: memref<1x128xf32, #tpu.memory_space<vmem>>, %arg6: memref<8x128xf32, #tpu.memory_space<vmem>>) attributes {dimension_semantics = [#tpu.dimension_semantics<parallel>], iteration_bounds = array<i64: 1>, scalar_prefetch = 0 : i64, scratch_operands = 0 : i64, tpu.core_type = #tpu.core_type<tc>, window_params = [{transform_indices = @transform_0, window_bounds = array<i64: 8, 32>}, {pipeline_mode = #tpu.pipeline_mode<synchronous>, transform_indices = @transform_1, window_bounds = array<i64: 32, 128>}, {pipeline_mode = #tpu.pipeline_mode<synchronous>, transform_indices = @transform_2, window_bounds = array<i64: 1, 128>}, {pipeline_mode = #tpu.pipeline_mode<synchronous>, transform_indices = @transform_3, window_bounds = array<i64: 128, 128>}, {pipeline_mode = #tpu.pipeline_mode<synchronous>, transform_indices = @transform_4, window_bounds = array<i64: 1, 128>}, {transform_indices = @transform_5, window_bounds = array<i64: 8, 128>}]} {
    %c0 = arith.constant 0 : index
    %c0_0 = arith.constant 0 : index
    %0 = vector.load %arg1[%c0, %c0_0] : memref<8x32xf32, #tpu.memory_space<vmem>>, vector<8x32xf32>
    %c0_1 = arith.constant 0 : index
    %c0_2 = arith.constant 0 : index
    %1 = vector.load %arg2[%c0_1, %c0_2] : memref<32x128xf32, #tpu.memory_space<vmem>>, vector<32x128xf32>
    %cst = arith.constant dense<0.000000e+00> : vector<8x128xf32>
    %2 = tpu.matmul %0, %1, %cst {dimension_numbers = #tpu.dot_dimension_numbers<[1], [0], [0], [1], [0, 0, 1, 1], [], []>} : vector<8x32xf32>, vector<32x128xf32>, vector<8x128xf32> -> vector<8x128xf32>
    %c0_3 = arith.constant 0 : index
    %c0_4 = arith.constant 0 : index
    %3 = vector.load %arg3[%c0_3, %c0_4] : memref<1x128xf32, #tpu.memory_space<vmem>>, vector<1x128xf32>
    %4 = vector.broadcast %3 : vector<1x128xf32> to vector<8x128xf32>
    %5 = arith.addf %2, %4 : vector<8x128xf32>
    %cst_5 = arith.constant 0.000000e+00 : f32
    %6 = vector.broadcast %cst_5 : f32 to vector<8x128xf32>
    %7 = arith.maximumf %5, %6 : vector<8x128xf32>
    %c0_6 = arith.constant 0 : index
    %c0_7 = arith.constant 0 : index
    %8 = vector.load %arg4[%c0_6, %c0_7] : memref<128x128xf32, #tpu.memory_space<vmem>>, vector<128x128xf32>
    %cst_8 = arith.constant dense<0.000000e+00> : vector<8x128xf32>
    %9 = tpu.matmul %7, %8, %cst_8 {dimension_numbers = #tpu.dot_dimension_numbers<[1], [0], [0], [1], [0, 0, 1, 1], [], []>} : vector<8x128xf32>, vector<128x128xf32>, vector<8x128xf32> -> vector<8x128xf32>
    %c0_9 = arith.constant 0 : index
    %c0_10 = arith.constant 0 : index
    %10 = vector.load %arg5[%c0_9, %c0_10] : memref<1x128xf32, #tpu.memory_space<vmem>>, vector<1x128xf32>
    %11 = vector.broadcast %10 : vector<1x128xf32> to vector<8x128xf32>
    %12 = arith.addf %9, %11 : vector<8x128xf32>
    %c0_11 = arith.constant 0 : index
    %c0_12 = arith.constant 0 : index
    %13 = vector.load %arg6[%c0_11, %c0_12] : memref<8x128xf32, #tpu.memory_space<vmem>>, vector<8x128xf32>
    tpu.vector_store %arg6[%c0_11, %c0_12], %12 {strides = array<i32>} : memref<8x128xf32, #tpu.memory_space<vmem>>, vector<8x128xf32>,
    return
  }
  func.func @transform_0(%arg0: i32) -> (i32, i32) {
    %c0_i32 = arith.constant 0 : i32
    %c0_i32_0 = arith.constant 0 : i32
    return %arg0, %c0_i32 : i32, i32
  }
  func.func @transform_1(%arg0: i32) -> (i32, i32) {
    %c0_i32 = arith.constant 0 : i32
    %c0_i32_0 = arith.constant 0 : i32
    %c0_i32_1 = arith.constant 0 : i32
    return %c0_i32, %c0_i32_0 : i32, i32
  }
  func.func @transform_2(%arg0: i32) -> (i32, i32) {
    %c0_i32 = arith.constant 0 : i32
    %c0_i32_0 = arith.constant 0 : i32
    %c0_i32_1 = arith.constant 0 : i32
    return %c0_i32, %c0_i32_0 : i32, i32
  }
  func.func @transform_3(%arg0: i32) -> (i32, i32) {
    %c0_i32 = arith.constant 0 : i32
    %c0_i32_0 = arith.constant 0 : i32
    %c0_i32_1 = arith.constant 0 : i32
    return %c0_i32, %c0_i32_0 : i32, i32
  }
  func.func @transform_4(%arg0: i32) -> (i32, i32) {
    %c0_i32 = arith.constant 0 : i32
    %c0_i32_0 = arith.constant 0 : i32
    %c0_i32_1 = arith.constant 0 : i32
    return %c0_i32, %c0_i32_0 : i32, i32
  }
  func.func @transform_5(%arg0: i32) -> (i32, i32) {
    %c0_i32 = arith.constant 0 : i32
    %c0_i32_0 = arith.constant 0 : i32
    return %arg0, %c0_i32 : i32, i32
  }
}

</mosaic_0001>

<bundles_post_ra>
// kernel: f1_forward.1
= control target key start
LH: loop header
LB: loop body
LE: loop exit
PB: predicated region body
PF: predicated region fallthrough
CT: control target
= control target key end

     0   :  { %10 = vsyncpa [#allocation3], 0  ;;  %s500_s0 = inlined_call_operand.hbm [shape: f32[8,32], index: 0, kind: input, shape index: {}]   ;;  %s501_s1 = inlined_call_operand.hbm [shape: f32[32,128], index: 1, kind: input, shape index: {}]   ;;  %s502_s2 = inlined_call_operand.vmem [shape: f32[1,128], index: 2, kind: input, shape index: {}]   ;;  %s503_s3 = inlined_call_operand.hbm [shape: f32[128,128], index: 3, kind: input, shape index: {}]   ;;  %s504_s4 = inlined_call_operand.vmem [shape: f32[1,128], index: 4, kind: input, shape index: {}]   ;;  %s505_s5 = inlined_call_operand.hbm [shape: f32[8,128], index: 5, kind: output, shape index: {}]  }
   0x1   :  { %11 = vsyncpa [#allocation6], 0 }
   0x2   :  { %12 = vsyncpa [#allocation4], 0  ;;  %s422_s18 = smov [#allocation5]  }
   0x3   :  { %s28_s19 = sshll.u32 %s422_s18, 4  ;;  %s29_s19 = int_to_ptr.vmem [resolvable:$true] %s28_s19 }
   0x4   :  { %s344_s20 = scalar_lea.vmem %s29_s19, 512  ;;  %p349_p1 = scmp.lt.s32.totalorder %s29_s19, %s29_s19 }
   0x5   :  { %p345_p0 = scmp.ne.s32.totalorder %s29_s19, %s344_s20  ;;  %p350_p2 = scmp.lt.s32.totalorder %s344_s20, %s344_s20 }
   0x7   :  { %p351_p3 = por %p350_p2, %p349_p1 }
   0x9   :  { %p352_p4 = pnand %p351_p3, %p345_p0 }
   0xb   :  { %355 = shalt.err (!%p352_p4)
}
   0xc   :  { %s423_s21 = smov 128   ;;  %s424_s22 = smov 8  }
   0xd   :  { %34 = dma.hbm_to_vmem [thread:$0]  %s501_s1, 512, %s29_s19, [#allocation6], %s423_s21, %s423_s21, %s424_s22  }
   0xe   :  { %s425_s25 = smov [#allocation2]   ;;  %s426_s27 = smov [#allocation7]  }
   0xf   :  { %s19_s26 = sshll.u32 %s425_s25, 4  ;;  %s42_s28 = sshll.u32 %s426_s27, 4  ;;  %s20_s26 = int_to_ptr.vmem [resolvable:$true] %s19_s26  ;;  %s43_s28 = int_to_ptr.vmem [resolvable:$true] %s42_s28 }
  0x10   :  { %s364_s29 = scalar_lea.vmem %s20_s26, 128  ;;  %p369_p6 = scmp.lt.s32.totalorder %s20_s26, %s20_s26 }
  0x11   :  { %p365_p5 = scmp.ne.s32.totalorder %s20_s26, %s364_s29  ;;  %p370_p7 = scmp.lt.s32.totalorder %s364_s29, %s364_s29 }
  0x13   :  { %p371_p8 = por %p370_p7, %p369_p6 }
  0x15   :  { %p372_p9 = pnand %p371_p8, %p365_p5 }
  0x17   :  { %375 = shalt.err (!%p372_p9)
}
  0x18   :  { %22 = dma.hbm_to_vmem [thread:$0]  %s500_s0, 128, %s20_s26, [#allocation3]  }
  0x19   :  { %s384_s7 = scalar_lea.vmem %s43_s28, 2048  ;;  %p389_p11 = scmp.lt.s32.totalorder %s43_s28, %s43_s28 }
  0x1a   :  { %p385_p10 = scmp.ne.s32.totalorder %s43_s28, %s384_s7  ;;  %p390_p12 = scmp.lt.s32.totalorder %s384_s7, %s384_s7 }
  0x1c   :  { %p391_p13 = por %p390_p12, %p389_p11 }
  0x1e   :  { %p392_p0 = pnand %p391_p13, %p385_p10 }
  0x20   :  { %395 = shalt.err (!%p392_p0)
}
  0x21   :  { %48 = dma.hbm_to_vmem [thread:$0]  %s503_s3, 2048, %s43_s28, [#allocation6], %s423_s21, %s423_s21, %s424_s22  }
  0x22   :  { %416 = dma.done.wait [#allocation3], 128  }
  0x23   :  { %417 = vsyncadd [#allocation3], 4294967168 }
  0x24   :  { %418 = dma.done.wait [#allocation6], 2560  }
  0x25   :  { %419 = vsyncadd [#allocation6], 4294964736  ;;  %v427_v0 = vmov 0.0   ;;  %vm428_vm0 = vmmov 0   ;;  %v64_v1 = vld [vmem:[#allocation5 + $0x18] sm:$0xff]  ;;  %v63_v2 = vld [vmem:[#allocation5 + $0x10] sm:$0xff] }
  0x26   :  { %282 = vmatprep.subr.mxu0 %v427_v0  ;;  %290 = vmatprep.mubr.msk.f32.mxu0 %vm428_vm0, %v427_v0  ;;  %v162_v3 = vld [vmem:[#allocation7 + $0x78] sm:$0xff]  ;;  %v62_v4 = vld [vmem:[#allocation5 + $0x8] sm:$0xff]  ;;  %v161_v5 = vld [vmem:[#allocation7 + $0x70] sm:$0xff]  ;;  %vm72_vm1 = vcmask 261120   ;;  %s429_s11 = smov [#allocation8]  }
  0x27   :  { %293 = vmatprep.subr.mxu1 %v427_v0  ;;  %325 = vmatprep.mubr.msk.f32.mxu1 %vm428_vm0, %v427_v0  ;;  %v160_v6 = vld [vmem:[#allocation7 + $0x68] sm:$0xff]  ;;  %v61_v7 = vld [vmem:[#allocation5] sm:$0xff]  ;;  %v60_v8 = vld [vmem:[#allocation2] sm:$0xff]  ;;  %s247_s12 = sshll.u32 %s429_s11, 4  ;;  %s248_s12 = int_to_ptr.vmem [resolvable:$true] %s247_s12 }
  0x28   :  { %283 = vmatpush3.msra.mxu0 %v64_v1  ;;  %294 = vmatpush3.msra.mxu1 %v162_v3  ;;  %v159_v9 = vld [vmem:[#allocation7 + $0x60] sm:$0xff]  ;;  %v158_v10 = vld [vmem:[#allocation7 + $0x58] sm:$0xff]  ;;  %v157_v11 = vld [vmem:[#allocation7 + $0x50] sm:$0xff]  ;;  %s396_s13 = scalar_lea.vmem %s248_s12, 128  ;;  %p401_p2 = scmp.lt.s32.totalorder %s248_s12, %s248_s12 }
  0x29   :  { %284 = vmatprep.subr.mxu0 %v427_v0  ;;  %295 = vmatprep.subr.mxu1 %v427_v0  ;;  %v156_v12 = vld [vmem:[#allocation7 + $0x48] sm:$0xff]  ;;  %v155_v13 = vld [vmem:[#allocation7 + $0x40] sm:$0xff]  ;;  %v154_v14 = vld [vmem:[#allocation7 + $0x38] sm:$0xff]  ;;  %p397_p1 = scmp.ne.s32.totalorder %s248_s12, %s396_s13  ;;  %p402_p3 = scmp.lt.s32.totalorder %s396_s13, %s396_s13 }
  0x2a   :  { %285 = vmatpush3.msra.mxu0 %v63_v2  ;;  %296 = vmatpush3.msra.mxu1 %v161_v5  ;;  %v153_v15 = vld [vmem:[#allocation7 + $0x30] sm:$0xff]  ;;  %v152_v16 = vld [vmem:[#allocation7 + $0x28] sm:$0xff]  ;;  %v151_v17 = vld [vmem:[#allocation7 + $0x20] sm:$0xff] }
  0x2b   :  { %286 = vmatprep.subr.mxu0 %v427_v0  ;;  %297 = vmatprep.subr.mxu1 %v427_v0  ;;  %v150_v18 = vld [vmem:[#allocation7 + $0x18] sm:$0xff]  ;;  %v149_v19 = vld [vmem:[#allocation7 + $0x10] sm:$0xff]  ;;  %v148_v20 = vld [vmem:[#allocation7 + $0x8] sm:$0xff]  ;;  %p403_p4 = por %p402_p3, %p401_p2 }
  0x2c   :  { %287 = vmatpush3.msra.mxu0 %v62_v4  ;;  %298 = vmatpush3.msra.mxu1 %v160_v6  ;;  %v147_v21 = vld [vmem:[#allocation7] sm:$0xff]  ;;  %v257_v22 = vld [vmem:[%s502_s2] ss:$0 sm:$0xff] }
  0x2d   :  { %288 = vmatprep.subr.mxu0 %v427_v0  ;;  %299 = vmatprep.subr.mxu1 %v427_v0  ;;  %v259_v27 = vld [vmem:[%s504_s4] ss:$0 sm:$0xff]  ;;  %p404_p5 = pnand %p403_p4, %p397_p1 }
  0x2e   :  { %289 = vmatpush3.msra.mxu0 %v61_v7  ;;  %300 = vmatpush3.msra.mxu1 %v159_v9 }
  0x2f   :  { %291 = vmatmul.mubr.msk.f32.vlgmr.msra.gmra.mxu0 %vm72_vm1, %v60_v8  ;;  %301 = vmatprep.subr.mxu1 %v427_v0 }
  0x30   :  { %302 = vmatpush3.msra.mxu1 %v158_v10 }
  0x31   :  { %303 = vmatprep.subr.mxu1 %v427_v0 }
  0x32   :  { %304 = vmatpush3.msra.mxu1 %v157_v11 }
  0x33   :  { %305 = vmatprep.subr.mxu1 %v427_v0 }
  0x34   :  { %306 = vmatpush3.msra.mxu1 %v156_v12 }
  0x35   :  { %307 = vmatprep.subr.mxu1 %v427_v0 }
  0x36   :  { %308 = vmatpush3.msra.mxu1 %v155_v13 }
  0x37   :  { %309 = vmatprep.subr.mxu1 %v427_v0 }
  0x38   :  { %310 = vmatpush3.msra.mxu1 %v154_v14 }
  0x39   :  { %311 = vmatprep.subr.mxu1 %v427_v0 }
  0x3a   :  { %312 = vmatpush3.msra.mxu1 %v153_v15 }
  0x3b   :  { %313 = vmatprep.subr.mxu1 %v427_v0 }
  0x3c   :  { %314 = vmatpush3.msra.mxu1 %v152_v16 }
  0x3d   :  { %315 = vmatprep.subr.mxu1 %v427_v0 }
  0x3e   :  { %316 = vmatpush3.msra.mxu1 %v151_v17 }
  0x3f   :  { %317 = vmatprep.subr.mxu1 %v427_v0 }
  0x40   :  { %318 = vmatpush3.msra.mxu1 %v150_v18 }
  0x41   :  { %319 = vmatprep.subr.mxu1 %v427_v0 }
  0x42   :  { %320 = vmatpush3.msra.mxu1 %v149_v19 }
  0x43   :  { %321 = vmatprep.subr.mxu1 %v427_v0 }
  0x44   :  { %322 = vmatpush3.msra.mxu1 %v148_v20 }
  0x45   :  { %323 = vmatprep.subr.mxu1 %v427_v0 }
  0x46   :  { %324 = vmatpush3.msra.mxu1 %v147_v21 }
  0xef   :  { %v142_v23 = vpop.f32.mrf.mxu0 }
  0xf0   :  { %v143_v24 = vadd.f32 %v257_v22, %v142_v23 }
  0xf1   :  { %v292_v25 = vpop.f32.mrf.mxu0 }
  0xf2   :  { %v146_v26 = vmax.f32 %v143_v24, 0.0 }
  0xf4   :  { %326 = vmatmul.mubr.f32.vlgmr.msra.gmra.mxu1 %v146_v26 }
 0x1b4   :  { %v236_v28 = vpop.f32.mrf.mxu1 }
 0x1b5   :  { %v237_v29 = vadd.f32 %v259_v27, %v236_v28 }
 0x1b6   :  { %v327_v30 = vpop.f32.mrf.mxu1 }
 0x1b7   :  { %240 = vst [vmem:[#allocation8] sm:$0xff] %v237_v29 }
 0x1b8   :  { %407 = shalt.err (!%p404_p5)
}
 0x1b9   :  { %250 = dma.vmem_to_hbm [thread:$0]  %s248_s12, 128, %s505_s5, [#allocation4]  }
 0x1ba   :  { %420 = dma.done.wait [#allocation4], 128  }
 0x1bb   :  { %421 = vsyncadd [#allocation4], 4294967168 }
 0x1bc   :  { %254 = vsyncpa [#allocation3], 1 }
 0x1bd   :  { %255 = vsyncpa [#allocation6], 1 }
 0x1be   :  { %256 = vsyncpa [#allocation4], 1 }

</bundles_post_ra>
